<compile_context>
chip_gen: v6e
topology: v6e:2x2x1
jax: 0.10.0
libtpu: 0.0.40
codegen_flags: <defaults>
</compile_context>

<pallas_src>
import functools

import jax
import jax.numpy as jnp
from jax import lax
from jax.experimental import pallas as pl
from jax.experimental.pallas import tpu as pltpu


def _cdiv(a: int, b: int) -> int:
    return (a + b - 1) // b


def _round_up(x: int, m: int) -> int:
    return _cdiv(x, m) * m


def _matvec_kernel(a_ref, b_ref, o_ref, acc_ref, *,
                   nc: int, cw: int, tr: int, tk: int, n_kb: int,
                   K: int, mask_needed: bool):
    """One grid step: fold a (tm, tk) A tile against a (1, tk) B chunk into
    a lane-resident (tm, cw) f32 accumulator; reduce on the last K step."""
    k = pl.program_id(1)
    tm = acc_ref.shape[0]

    @pl.when(k == 0)
    def _init():
        acc_ref[...] = jnp.zeros_like(acc_ref)

    n_full = tm // tr
    rem = tm - n_full * tr
    last_off = (n_kb - 1) * tk  # static global column offset of last K block

    def accum_rows(row_off, rows: int, masked: bool):
        # Register-resident psum for this row sub-block (rows <= 64).
        psum = jnp.zeros((rows, cw), jnp.float32)
        for c in range(nc):
            start = c * cw
            if masked:
                valid = K - (last_off + start)
                if valid <= 0:          # chunk entirely past K: skip (static)
                    continue
            a_c = a_ref[pl.ds(row_off, rows), pl.ds(start, cw)].astype(jnp.float32)
            b_c = b_ref[0:1, pl.ds(start, cw)].astype(jnp.float32)
            prod = a_c * b_c
            if masked and valid < cw:   # ragged tail chunk: zero garbage lanes
                lane = lax.broadcasted_iota(jnp.int32, (rows, cw), 1)
                prod = jnp.where(lane < valid, prod, 0.0)
            psum = psum + prod
        # One VMEM read-modify-write per sub-block (bounded live range).
        acc_ref[pl.ds(row_off, rows), :] += psum

    def run(masked: bool):
        if n_full > 0:
            def body(rb, carry):
                accum_rows(pl.multiple_of(rb * tr, tr), tr, masked)
                return carry
            lax.fori_loop(0, n_full, body, 0)
        if rem > 0:
            accum_rows(n_full * tr, rem, masked)

    if mask_needed:
        @pl.when(k == n_kb - 1)
        def _masked():
            run(True)

        @pl.when(k != n_kb - 1)
        def _unmasked():
            run(False)
    else:
        run(False)

    @pl.when(k == n_kb - 1)
    def _finalize():
        # Single cross-lane (XLU) reduction, only once per M tile.
        o_ref[...] = jnp.sum(acc_ref[...], axis=-1, keepdims=True).astype(o_ref.dtype)


def matvec_mul(A: jax.Array, B: jax.Array) -> jax.Array:
    """Pallas equivalent of matvec_mul_cuda: (M, K) @ (K, 1) -> (M, 1)."""
    M, K = A.shape
    assert B.ndim == 2 and B.shape == (K, 1), "B must have shape (K, 1)"
    dtype = A.dtype
    itemsize = jnp.dtype(dtype).itemsize
    row_align = {4: 8, 2: 16, 1: 32}.get(itemsize, 8)

    # ---- M (row) tiling: balanced; >=2 blocks when possible (v7x megacore) --
    max_tm = 512
    n_mb = max(1, _cdiv(M, max_tm))
    if M >= 2 * row_align:
        n_mb = max(n_mb, 2)
    tm = _round_up(_cdiv(M, n_mb), row_align)
    if tm >= M:
        tm = M                      # single (possibly unaligned) full block
    grid_m = _cdiv(M, tm)

    # ---- K (column) tiling: balanced chunks within a ~12 MiB tile budget ----
    tile_budget = 12 * 1024 * 1024
    if K <= 128:
        nc, cw, tk, n_kb = 1, K, K, 1
    else:
        k_chunks = _cdiv(K, 128)
        max_chunks = max(1, min(128, tile_budget // (tm * 128 * itemsize)))
        n_kb0 = _cdiv(k_chunks, max_chunks)
        if n_kb0 == 1 and K % 128 != 0:
            n_kb0 = 2               # keep tk <= K so only the last K block is ragged
        nc = _cdiv(k_chunks, n_kb0)
        tk = nc * 128
        cw = 128
        n_kb = _cdiv(k_chunks, nc)
    mask_needed = (n_kb * tk > K)

    tr = min(64, tm)                # rows per register-resident sub-block

    # Lane-dense B; zero-pad only B (tiny) so its blocks are always full.
    B_row = B.reshape(1, K)
    K_cov = n_kb * tk
    if K_cov != K:
        B_row = jnp.pad(B_row, ((0, 0), (0, K_cov - K)))

    kernel = functools.partial(_matvec_kernel, nc=nc, cw=cw, tr=tr, tk=tk,
                               n_kb=n_kb, K=K, mask_needed=mask_needed)

    out = pl.pallas_call(
        kernel,
        out_shape=jax.ShapeDtypeStruct((M, 1), dtype),
        grid_spec=pltpu.PrefetchScalarGridSpec(
            num_scalar_prefetch=0,
            grid=(grid_m, n_kb),
            in_specs=[
                pl.BlockSpec((tm, tk), lambda i, k: (i, k)),   # A tile (streamed)
                pl.BlockSpec((1, tk), lambda i, k: (0, k)),    # B chunk (lane-dense)
            ],
            out_specs=pl.BlockSpec((tm, 1), lambda i, k: (i, 0)),
            scratch_shapes=[pltpu.VMEM((tm, cw), jnp.float32)],  # lane-resident acc
        ),
        compiler_params=pltpu.CompilerParams(
            dimension_semantics=("parallel", "arbitrary"),
            vmem_limit_bytes=32 * 1024 * 1024,
        ),
        cost_estimate=pl.CostEstimate(
            flops=2 * M * K,
            transcendentals=0,
            bytes_accessed=itemsize * (M * K + K + M),
        ),
    )(A, B_row)

    return out


if __name__ == "__main__":
    key = jax.random.PRNGKey(0)
    ka, kb = jax.random.split(key)

    def _check(M, K):
        a = jax.random.normal(ka, (M, K), dtype=jnp.float32)
        b = jax.random.normal(kb, (K, 1), dtype=jnp.float32)
        c = matvec_mul(a, b)
        jax.block_until_ready(c)
        ref = jnp.matmul(a, b, precision=jax.lax.Precision.HIGHEST)
        assert c.shape == (M, 1), f"bad shape at M={M}, K={K}"
        assert jnp.allclose(c, ref, atol=1e-3, rtol=1e-3), f"mismatch at M={M}, K={K}"

    _check(256, 1024)   # aligned shapes, single K block, 2 M blocks
    _check(200, 1500)   # ragged M and K: partial blocks + in-kernel K-tail mask
    _check(64, 100)     # K < 128 path (narrow single chunk)

    print("KERNEL_OK")
</pallas_src>

<mosaic_0001>
module attributes {stable_mosaic.version = 11 : i64} {
  func.func @_matvec_kernel(%arg0: i32, %arg1: i32, %arg2: memref<128x1024xf32, #tpu.memory_space<vmem>>, %arg3: memref<1x1024xf32, #tpu.memory_space<vmem>>, %arg4: memref<128x1xf32, #tpu.memory_space<vmem>>, %arg5: memref<128x128xf32, #tpu.memory_space<vmem>>) attributes {dimension_semantics = [#tpu.dimension_semantics<parallel>, #tpu.dimension_semantics<arbitrary>], iteration_bounds = array<i64: 2, 1>, scalar_prefetch = 0 : i64, scratch_operands = 1 : i64, tpu.core_type = #tpu.core_type<tc>, window_params = [{transform_indices = @transform_0, window_bounds = array<i64: 128, 1024>}, {transform_indices = @transform_1, window_bounds = array<i64: 1, 1024>}, {transform_indices = @transform_2, window_bounds = array<i64: 128, 1>}]} {
    %c0_i32 = arith.constant 0 : i32
    %0 = arith.cmpi eq, %arg1, %c0_i32 : i32
    %1 = arith.extui %0 : i1 to i32
    %c0_i32_0 = arith.constant 0 : i32
    %2 = arith.cmpi ne, %1, %c0_i32_0 : i32
    scf.if %2 {
      %cst = arith.constant 0.000000e+00 : f32
      %7 = vector.broadcast %cst : f32 to vector<128x128xf32>
      %c0 = arith.constant 0 : index
      %c0_5 = arith.constant 0 : index
      %8 = vector.load %arg5[%c0, %c0_5] : memref<128x128xf32, #tpu.memory_space<vmem>>, vector<128x128xf32>
      tpu.vector_store %arg5[%c0, %c0_5], %7 {strides = array<i32>} : memref<128x128xf32, #tpu.memory_space<vmem>>, vector<128x128xf32>,
    } else {
    }
    %c0_i32_1 = arith.constant 0 : i32
    %c2_i32 = arith.constant 2 : i32
    %3 = arith.addi %c0_i32_1, %c2_i32 : i32
    %c1_i32 = arith.constant 1 : i32
    scf.for %arg6 = %c0_i32_1 to %3 step %c1_i32  : i32 {
      %c64_i32 = arith.constant 64 : i32
      %7 = arith.muli %arg6, %c64_i32 : i32
      %8 = tpu.assume_multiple %7, 64 : i32
      %cst = arith.constant 0.000000e+00 : f32
      %9 = vector.broadcast %cst : f32 to vector<64x128xf32>
      %10 = arith.index_cast %8 : i32 to index
      %c0 = arith.constant 0 : index
      %11 = vector.load %arg2[%10, %c0] : memref<128x1024xf32, #tpu.memory_space<vmem>>, vector<64x128xf32>
      %c0_5 = arith.constant 0 : index
      %c0_6 = arith.constant 0 : index
      %12 = vector.load %arg3[%c0_5, %c0_6] : memref<1x1024xf32, #tpu.memory_space<vmem>>, vector<1x128xf32>
      %13 = vector.broadcast %12 : vector<1x128xf32> to vector<64x128xf32>
      %14 = arith.mulf %11, %13 : vector<64x128xf32>
      %15 = arith.addf %9, %14 : vector<64x128xf32>
      %16 = arith.index_cast %8 : i32 to index
      %c128 = arith.constant 128 : index
      %17 = vector.load %arg2[%16, %c128] : memref<128x1024xf32, #tpu.memory_space<vmem>>, vector<64x128xf32>
      %c0_7 = arith.constant 0 : index
      %c128_8 = arith.constant 128 : index
      %18 = vector.load %arg3[%c0_7, %c128_8] : memref<1x1024xf32, #tpu.memory_space<vmem>>, vector<1x128xf32>
      %19 = vector.broadcast %18 : vector<1x128xf32> to vector<64x128xf32>
      %20 = arith.mulf %17, %19 : vector<64x128xf32>
      %21 = arith.addf %15, %20 : vector<64x128xf32>
      %22 = arith.index_cast %8 : i32 to index
      %c256 = arith.constant 256 : index
      %23 = vector.load %arg2[%22, %c256] : memref<128x1024xf32, #tpu.memory_space<vmem>>, vector<64x128xf32>
      %c0_9 = arith.constant 0 : index
      %c256_10 = arith.constant 256 : index
      %24 = vector.load %arg3[%c0_9, %c256_10] : memref<1x1024xf32, #tpu.memory_space<vmem>>, vector<1x128xf32>
      %25 = vector.broadcast %24 : vector<1x128xf32> to vector<64x128xf32>
      %26 = arith.mulf %23, %25 : vector<64x128xf32>
      %27 = arith.addf %21, %26 : vector<64x128xf32>
      %28 = arith.index_cast %8 : i32 to index
      %c384 = arith.constant 384 : index
      %29 = vector.load %arg2[%28, %c384] : memref<128x1024xf32, #tpu.memory_space<vmem>>, vector<64x128xf32>
      %c0_11 = arith.constant 0 : index
      %c384_12 = arith.constant 384 : index
      %30 = vector.load %arg3[%c0_11, %c384_12] : memref<1x1024xf32, #tpu.memory_space<vmem>>, vector<1x128xf32>
      %31 = vector.broadcast %30 : vector<1x128xf32> to vector<64x128xf32>
      %32 = arith.mulf %29, %31 : vector<64x128xf32>
      %33 = arith.addf %27, %32 : vector<64x128xf32>
      %34 = arith.index_cast %8 : i32 to index
      %c512 = arith.constant 512 : index
      %35 = vector.load %arg2[%34, %c512] : memref<128x1024xf32, #tpu.memory_space<vmem>>, vector<64x128xf32>
      %c0_13 = arith.constant 0 : index
      %c512_14 = arith.constant 512 : index
      %36 = vector.load %arg3[%c0_13, %c512_14] : memref<1x1024xf32, #tpu.memory_space<vmem>>, vector<1x128xf32>
      %37 = vector.broadcast %36 : vector<1x128xf32> to vector<64x128xf32>
      %38 = arith.mulf %35, %37 : vector<64x128xf32>
      %39 = arith.addf %33, %38 : vector<64x128xf32>
      %40 = arith.index_cast %8 : i32 to index
      %c640 = arith.constant 640 : index
      %41 = vector.load %arg2[%40, %c640] : memref<128x1024xf32, #tpu.memory_space<vmem>>, vector<64x128xf32>
      %c0_15 = arith.constant 0 : index
      %c640_16 = arith.constant 640 : index
      %42 = vector.load %arg3[%c0_15, %c640_16] : memref<1x1024xf32, #tpu.memory_space<vmem>>, vector<1x128xf32>
      %43 = vector.broadcast %42 : vector<1x128xf32> to vector<64x128xf32>
      %44 = arith.mulf %41, %43 : vector<64x128xf32>
      %45 = arith.addf %39, %44 : vector<64x128xf32>
      %46 = arith.index_cast %8 : i32 to index
      %c768 = arith.constant 768 : index
      %47 = vector.load %arg2[%46, %c768] : memref<128x1024xf32, #tpu.memory_space<vmem>>, vector<64x128xf32>
      %c0_17 = arith.constant 0 : index
      %c768_18 = arith.constant 768 : index
      %48 = vector.load %arg3[%c0_17, %c768_18] : memref<1x1024xf32, #tpu.memory_space<vmem>>, vector<1x128xf32>
      %49 = vector.broadcast %48 : vector<1x128xf32> to vector<64x128xf32>
      %50 = arith.mulf %47, %49 : vector<64x128xf32>
      %51 = arith.addf %45, %50 : vector<64x128xf32>
      %52 = arith.index_cast %8 : i32 to index
      %c896 = arith.constant 896 : index
      %53 = vector.load %arg2[%52, %c896] : memref<128x1024xf32, #tpu.memory_space<vmem>>, vector<64x128xf32>
      %c0_19 = arith.constant 0 : index
      %c896_20 = arith.constant 896 : index
      %54 = vector.load %arg3[%c0_19, %c896_20] : memref<1x1024xf32, #tpu.memory_space<vmem>>, vector<1x128xf32>
      %55 = vector.broadcast %54 : vector<1x128xf32> to vector<64x128xf32>
      %56 = arith.mulf %53, %55 : vector<64x128xf32>
      %57 = arith.addf %51, %56 : vector<64x128xf32>
      %58 = arith.index_cast %8 : i32 to index
      %c0_21 = arith.constant 0 : index
      %59 = vector.load %arg5[%58, %c0_21] : memref<128x128xf32, #tpu.memory_space<vmem>>, vector<64x128xf32>
      %60 = arith.addf %59, %57 : vector<64x128xf32>
      %61 = arith.index_cast %8 : i32 to index
      %c0_22 = arith.constant 0 : index
      %62 = vector.load %arg5[%61, %c0_22] : memref<128x128xf32, #tpu.memory_space<vmem>>, vector<64x128xf32>
      tpu.vector_store %arg5[%61, %c0_22], %60 {strides = array<i32>} : memref<128x128xf32, #tpu.memory_space<vmem>>, vector<64x128xf32>,
    }
    %c2_i32_2 = arith.constant 2 : i32
    %c0_i32_3 = arith.constant 0 : i32
    %4 = arith.cmpi eq, %arg1, %c0_i32_3 : i32
    %5 = arith.extui %4 : i1 to i32
    %c0_i32_4 = arith.constant 0 : i32
    %6 = arith.cmpi ne, %5, %c0_i32_4 : i32
    scf.if %6 {
      %c0 = arith.constant 0 : index
      %c0_5 = arith.constant 0 : index
      %7 = vector.load %arg5[%c0, %c0_5] : memref<128x128xf32, #tpu.memory_space<vmem>>, vector<128x128xf32>
      %cst = arith.constant dense<0.000000e+00> : vector<128xf32>
      %8 = vector.multi_reduction <add>, %7, %cst [1] : vector<128x128xf32> to vector<128xf32>
      %9 = vector.shape_cast %8 : vector<128xf32> to vector<128x1xf32>
      %c0_6 = arith.constant 0 : index
      %c0_7 = arith.constant 0 : index
      %10 = vector.load %arg4[%c0_6, %c0_7] : memref<128x1xf32, #tpu.memory_space<vmem>>, vector<128x1xf32>
      tpu.vector_store %arg4[%c0_6, %c0_7], %9 {strides = array<i32>} : memref<128x1xf32, #tpu.memory_space<vmem>>, vector<128x1xf32>,
    } else {
    }
    return
  }
  func.func @transform_0(%arg0: i32, %arg1: i32) -> (i32, i32) {
    %c0_i32 = arith.constant 0 : i32
    return %arg0, %arg1 : i32, i32
  }
  func.func @transform_1(%arg0: i32, %arg1: i32) -> (i32, i32) {
    %c0_i32 = arith.constant 0 : i32
    %c0_i32_0 = arith.constant 0 : i32
    return %c0_i32, %arg1 : i32, i32
  }
  func.func @transform_2(%arg0: i32, %arg1: i32) -> (i32, i32) {
    %c0_i32 = arith.constant 0 : i32
    %c0_i32_0 = arith.constant 0 : i32
    return %arg0, %c0_i32 : i32, i32
  }
}

</mosaic_0001>

<bundles_post_ra>
// kernel: tpu_custom_call.1
= control target key start
LH: loop header
LB: loop body
LE: loop exit
PB: predicated region body
PF: predicated region fallthrough
CT: control target
= control target key end

     0   :  { %7 = vsyncpa [#allocation4], 0  ;;  %s1266_s0 = inlined_call_operand.hbm [shape: f32[256,1024], index: 0, kind: input, shape index: {}]   ;;  %s1267_s1 = inlined_call_operand.hbm [shape: f32[1,1024], index: 1, kind: input, shape index: {}]   ;;  %s1268_s2 = inlined_call_operand.vmem [shape: f32[256,1], index: 2, kind: output, shape index: {}]  }
   0x1   :  { %9 = vsyncpa [#allocation4 + $0x1], 0 }
   0x2   :  { %10 = vsyncpa [#allocation6], 0  ;;  %s924_s9 = smov 0   ;;  %s926_s10 = smov 0  }
   0x3   :  { %s928_s11 = smov 0   ;;  %s930_s12 = smov 0  }
   0x4   :  { %s932_s13 = smov 0   ;;  %s934_s14 = smov 0  }
   0x5 LB: > { %s679_s15 = sadd.s32 4294967295, %s898_s14   ;;  %s37_s16 = sadd.s32 1, %s886_s11  ;;  %s898_s14 = sphi %s934_s14, %s16_s14   ;;  %s894_s13 = sphi %s932_s13, %s1283_s13   ;;  %s890_s12 = sphi %s930_s12, %s1282_s12   ;;  %s886_s11 = sphi %s928_s11, %s1281_s11   ;;  %s882_s10 = sphi %s926_s10, %s1280_s10   ;;  %s878_s9 = sphi %s924_s9, %s1279_s9  }
   0x6   : > { %p44_p0 = scmp.ne.s32.totalorder %s886_s11, %s882_s10  ;;  %p45_p1 = scmp.eq.s32.totalorder %s898_s14, 0 }
   0x7   : > { %p50_p2 = scmp.ne.s32.totalorder %s882_s10, %s878_s9  ;;  %p958_p3 = scmp.eq.s32.totalorder %s679_s15, 0 }
   0x8   : > { %p46_p4 = por %p45_p1, %p44_p0  ;;  %p681_p5 = scmp.ge.s32.totalorder %s898_s14, 1 }
   0x9   : > { %p965_p6 = por %p958_p3, %p50_p2  ;;  %p113_p7 = scmp.lt.s32.totalorder %s898_s14, 3 }
   0xa   : > { %s904_s20 = smov [#allocation5]   ;;  %p724_p10 = scmp.lt.s32.totalorder %s898_s14, 2 }
   0xb   : > { %s1272_s18 = scalar_select %p965_p6, 1, 0 }
   0xc   : > { %p970_p8 = pnand %p681_p5, %p113_p7  ;;  %s129_s21 = sshll.u32 %s904_s20, 4  ;;  %s130_s21 = int_to_ptr.vmem [resolvable:$true] %s129_s21 }
   0xd   : > { %s140_s22 = sand.u32 1, %s886_s11   ;;  %p980_p12 = pnand %p724_p10, %p46_p4 }
   0xe   : > { %s1273_s19 = scalar_select %p970_p8, 1, 0 }
   0xf   : > { %p715_p9 = pneg %p970_p8  ;;  %s797_s24 = scalar_lea.vmem %s130_s21, 128 }
  0x10   : > { %p798_p0 = scmp.ne.s32.totalorder %s130_s21, %s797_s24  ;;  %p805_p5 = scmp.lt.s32.totalorder %s130_s21, %s130_s21 }
  0x11   : > { %p716_p11 = pnand %p715_p9, %p958_p3  ;;  %p806_p7 = scmp.lt.s32.totalorder %s797_s24, %s797_s24 }
  0x13   : > { %p788_p13 = pneg %p716_p11  ;;  %p807_p6 = por %p806_p7, %p805_p5 }
  0x15   : > { %p800_p1 = pnand %p798_p0, %p788_p13 }
  0x17   : > { %p801_p2 = pneg %p800_p1 }
  0x19   : > { %p808_p8 = pnand %p807_p6, %p801_p2 }
  0x1b   : > { %811 = shalt.err (!%p808_p8)
}
  0x1c   : > { %718 = dma.hbm_to_vmem [thread:$0]  (!%p716_p11), %s1267_s1, 128, %s130_s21, [#allocation6]  }
  0x1d   : > { %s28_s27 = sadd.s32 1, %s894_s13  ;;  %s684_s28 = sshll.u32 %s140_s22, 10 }
  0x1e   : > { %p30_p4 = scmp.ge.s32.totalorder %s28_s27, 2  ;;  %s707_s29 = sshll.u32 %s894_s13, 14 }
  0x1f   : > { %s144_s30 = scalar_lea.vmem [#allocation3], %s684_s28  ;;  %s153_s6 = scalar_lea.hbm %s1266_s0, %s707_s29 }
  0x20   : > { %s154_s3 = sshll.u32 %s144_s30, 4  ;;  %s1285_s27 = smov (%p30_p4, %s28_s27), 0  ;;  %s155_s3 = int_to_ptr.vmem [resolvable:$true] %s154_s3 }
  0x21   : > { %s32_s7 = ssub.s32 %s894_s13, %s1285_s27  ;;  %s141_s9 = scalar_lea.sflag [#allocation4], %s140_s22 }
  0x22   : > { %p996_p6 = scmp.eq.s32.totalorder %s32_s7, 0  ;;  %p814_p8 = pneg %p980_p12 }
  0x23   : > { %s825_s15 = scalar_lea.vmem %s155_s3, 16384  ;;  %s905_s20 = smov [#allocation3]  }
  0x24   : > { %p826_p9 = scmp.ne.s32.totalorder %s155_s3, %s825_s15  ;;  %s830_s21 = sshll.u32 %s905_s20, 4  ;;  %s831_s21 = int_to_ptr.vmem [resolvable:$false] %s830_s21 }
  0x25   : > { %s832_s24 = scalar_lea.vmem %s831_s21, 32768  ;;  %p833_p13 = scmp.lt.s32.totalorder %s155_s3, %s831_s21 }
  0x26   : > { %p828_p10 = pnand %p826_p9, %p814_p8  ;;  %p834_p0 = scmp.lt.s32.totalorder %s832_s24, %s825_s15 }
  0x28   : > { %p829_p11 = pneg %p828_p10  ;;  %p835_p1 = por %p834_p0, %p833_p13 }
  0x2a   : > { %p836_p2 = pnand %p835_p1, %p829_p11 }
  0x2c   : > { %839 = shalt.err (!%p836_p2)
}
  0x2d   : > { %s906_s25 = smov 1024   ;;  %s907_s22 = smov 64  }
  0x2e   : > { %722 = dma.hbm_to_vmem [thread:$0]  (!%p980_p12), %s153_s6, 16384, %s155_s3, %s141_s9, %s906_s25, %s906_s25, %s907_s22  }
  0x2f   : > { %s1009_s26 = scalar_select %p996_p6, %s886_s11, %s37_s16  }
  0x30   : > { %p1276_p5 = scmp.ne.s32.totalorder %s1273_s19, 0 }
  0x31   : > { %s168_s28 = sand.u32 (!%p1276_p5), 1, %s882_s10   ;;  %p1277_p7 = scmp.ne.s32.totalorder (!%p1276_p5), %s1272_s18, 0 }
  0x32   : > { %166 = sbr.rel (%p1276_p5) target bundleno = 289 (0x121), region = 28  ;;  %s1014_s29 = sshll.u32 (!%p1276_p5), %s168_s28, 10 }
  0x33   : > { %s169_s30 = scalar_lea.sflag (!%p1276_p5), [#allocation4], %s168_s28  ;;  %s172_s4 = scalar_lea.vmem (!%p1276_p5), [#allocation3], %s1014_s29 }
  0x37   : > { %869 = dma.done.wait (%p1277_p7), %s169_s30, 16384  }
  0x38   : > { %871 = vsyncadd (%p1277_p7), %s169_s30, 4294950912 }
  0x39   : > { %873 = dma.done.wait (%p958_p3), [#allocation6], 128  }
  0x3a   : > { %875 = vsyncadd (%p958_p3), [#allocation6], 4294967168  ;;  %s691_s16 = sshll.u32 %s890_s12, 4  ;;  %v908_v0 = vmov 0.0   ;;  %s1037_s3 = smov 0  }
  0x3b   : > { %p1026_p12 = scmp.lt.s32.totalorder %s691_s16, 31  ;;  %210 = vst [vmem:[#allocation2] sm:$0xff] %v908_v0  ;;  %211 = vst [vmem:[#allocation2 + $0x8] sm:$0xff] %v908_v0 }
  0x3c   : > { %212 = vst [vmem:[#allocation2 + $0x10] sm:$0xff] %v908_v0  ;;  %213 = vst [vmem:[#allocation2 + $0x18] sm:$0xff] %v908_v0 }
  0x3d   : > { %214 = vst [vmem:[#allocation2 + $0x20] sm:$0xff] %v908_v0  ;;  %215 = vst [vmem:[#allocation2 + $0x28] sm:$0xff] %v908_v0  ;;  %s1287_s16 = smov (!%p1026_p12, %s691_s16), 31 }
  0x3e   : > { %216 = vst [vmem:[#allocation2 + $0x30] sm:$0xff] %v908_v0  ;;  %217 = vst [vmem:[#allocation2 + $0x38] sm:$0xff] %v908_v0  ;;  %s692_s12 = sshll.u32 %s1287_s16, 3 }
  0x3f   : > { %218 = vst [vmem:[#allocation2 + $0x40] sm:$0xff] %v908_v0  ;;  %219 = vst [vmem:[#allocation2 + $0x48] sm:$0xff] %v908_v0  ;;  %s1035_s23 = scalar_lea.vmem %s1268_s2, %s692_s12 }
  0x40   : > { %220 = vst [vmem:[#allocation2 + $0x50] sm:$0xff] %v908_v0  ;;  %221 = vst [vmem:[#allocation2 + $0x58] sm:$0xff] %v908_v0 }
  0x41   : > { %222 = vst [vmem:[#allocation2 + $0x60] sm:$0xff] %v908_v0  ;;  %223 = vst [vmem:[#allocation2 + $0x68] sm:$0xff] %v908_v0 }
  0x42   : > { %224 = vst [vmem:[#allocation2 + $0x70] sm:$0xff] %v908_v0  ;;  %225 = vst [vmem:[#allocation2 + $0x78] sm:$0xff] %v908_v0 }
  0x43 LB: >> { %s693_s5 = sshll.u32 %s902_s3, 6  ;;  %v1045_v1 = vld [vmem:[#allocation5] ss:$0 sm:$0xff]  ;;  %v1047_v2 = vld [vmem:[#allocation5 + $0x1] ss:$0 sm:$0xff]  ;;  %s231_s3 = sadd.s32 1, %s902_s3   ;;  %s902_s3 = sphi %s1037_s3, %s231_s3  }
  0x44   : >> { %s233_s6 = sshra.s32 %s693_s5, 3  ;;  %v1049_v3 = vld [vmem:[#allocation5 + $0x2] ss:$0 sm:$0xff]  ;;  %v1055_v4 = vld [vmem:[#allocation5 + $0x3] ss:$0 sm:$0xff]  ;;  %s1134_s9 = scalar_lea.vmem [#allocation2], %s693_s5 }
  0x45   : >> { %s708_s7 = sshll.u32 %s233_s6, 6  ;;  %v1057_v5 = vld [vmem:[#allocation5 + $0x4] ss:$0 sm:$0xff]  ;;  %v1059_v6 = vld [vmem:[#allocation5 + $0x5] ss:$0 sm:$0xff]  ;;  %p228_p3 = scmp.ge.s32.totalorder %s231_s3, 2  }
  0x46   : >> { %s1053_s8 = scalar_lea.vmem %s172_s4, %s708_s7 [#allocation3]  ;;  %v1064_v10 = vld [vmem:[#allocation5 + $0x6] ss:$0 sm:$0xff]  ;;  %v1066_v11 = vld [vmem:[#allocation5 + $0x7] ss:$0 sm:$0xff]  ;;  %vm562_vm0 = vcmask (%p228_p3), 7168  }
  0x47   : >> { %v238_v7 = vld [vmem:[%s1053_s8] sm:$0xff]  ;;  %v269_v8 = vld [vmem:[%s1053_s8 + $0x8] sm:$0xff]  ;;  %v300_v9 = vld [vmem:[%s1053_s8 + $0x10] sm:$0xff] }
  0x48   : >> { %v253_v12 = vmul.f32 %v1045_v1, %v238_v7  ;;  %v284_v13 = vmul.f32 %v1047_v2, %v269_v8  ;;  %v315_v14 = vmul.f32 %v1049_v3, %v300_v9  ;;  %v331_v15 = vld [vmem:[%s1053_s8 + $0x18] sm:$0xff]  ;;  %v362_v16 = vld [vmem:[%s1053_s8 + $0x20] sm:$0xff]  ;;  %v393_v17 = vld [vmem:[%s1053_s8 + $0x28] sm:$0xff] }
  0x49   : >> { %v424_v18 = vld [vmem:[%s1053_s8 + $0x30] sm:$0xff]  ;;  %v455_v19 = vld [vmem:[%s1053_s8 + $0x38] sm:$0xff]  ;;  %v239_v20 = vld [vmem:[%s1053_s8 + $0x40] sm:$0xff]  ;;  %v346_v22 = vmul.f32 %v1055_v4, %v331_v15  ;;  %v377_v27 = vmul.f32 %v1057_v5, %v362_v16  ;;  %v408_v28 = vmul.f32 %v1059_v6, %v393_v17 }
  0x4a   : >> { %v292_v21 = vadd.f32 %v284_v13, %v253_v12  ;;  %v254_v23 = vmul.f32 %v1045_v1, %v239_v20  ;;  %v270_v24 = vld [vmem:[%s1053_s8 + $0x48] sm:$0xff]  ;;  %v301_v25 = vld [vmem:[%s1053_s8 + $0x50] sm:$0xff]  ;;  %v332_v26 = vld [vmem:[%s1053_s8 + $0x58] sm:$0xff]  ;;  %v439_v35 = vmul.f32 %v1064_v10, %v424_v18  ;;  %v470_v36 = vmul.f32 %v1066_v11, %v455_v19 }
  0x4b   : >> { %v285_v29 = vmul.f32 %v1047_v2, %v270_v24  ;;  %v316_v30 = vmul.f32 %v1049_v3, %v301_v25  ;;  %v363_v31 = vld [vmem:[%s1053_s8 + $0x60] sm:$0xff]  ;;  %v394_v32 = vld [vmem:[%s1053_s8 + $0x68] sm:$0xff]  ;;  %v425_v33 = vld [vmem:[%s1053_s8 + $0x70] sm:$0xff]  ;;  %v347_v37 = vmul.f32 %v1055_v4, %v332_v26 }
  0x4c   : >> { %v323_v34 = vadd.f32 %v315_v14, %v292_v21  ;;  %v456_v38 = vld [vmem:[%s1053_s8 + $0x78] sm:$0xff]  ;;  %v240_v39 = vld [vmem:[%s1053_s8 + $0x80] sm:$0xff]  ;;  %v271_v40 = vld [vmem:[%s1053_s8 + $0x88] sm:$0xff]  ;;  %v378_v42 = vmul.f32 %v1057_v5, %v363_v31  ;;  %v409_v49 = vmul.f32 %v1059_v6, %v394_v32  ;;  %v440_v50 = vmul.f32 %v1064_v10, %v425_v33 }
  0x4d   : >> { %v293_v41 = vadd.f32 %v285_v29, %v254_v23  ;;  %v255_v43 = vmul.f32 %v1045_v1, %v240_v39  ;;  %v286_v44 = vmul.f32 %v1047_v2, %v271_v40  ;;  %v302_v45 = vld [vmem:[%s1053_s8 + $0x90] sm:$0xff]  ;;  %v333_v46 = vld [vmem:[%s1053_s8 + $0x98] sm:$0xff]  ;;  %v364_v47 = vld [vmem:[%s1053_s8 + $0xa0] sm:$0xff]  ;;  %v471_v55 = vmul.f32 %v1066_v11, %v456_v38 }
  0x4e   : >> { %v354_v48 = vadd.f32 %v346_v22, %v323_v34  ;;  %v317_v51 = vmul.f32 %v1049_v3, %v302_v45  ;;  %v395_v52 = vld [vmem:[%s1053_s8 + $0xa8] sm:$0xff]  ;;  %v426_v53 = vld [vmem:[%s1053_s8 + $0xb0] sm:$0xff]  ;;  %v348_v57 = vmul.f32 %v1055_v4, %v333_v46  ;;  %v241_v58 = vld [vmem:[%s1053_s8 + $0xc0] sm:$0xff]  ;;  %v379_v62 = vmul.f32 %v1057_v5, %v364_v47 }
  0x4f   : >> { %v324_v54 = vadd.f32 %v316_v30, %v293_v41  ;;  %v294_v56 = vadd.f32 %v286_v44, %v255_v43  ;;  %v272_v59 = vld [vmem:[%s1053_s8 + $0xc8] sm:$0xff]  ;;  %v303_v60 = vld [vmem:[%s1053_s8 + $0xd0] sm:$0xff]  ;;  %v457_v63 = vld [vmem:[%s1053_s8 + $0xb8] sm:$0xff]  ;;  %v256_v0 = vmul.f32 %v1045_v1, %v241_v58  ;;  %v410_v14 = vmul.f32 %v1059_v6, %v395_v52 }
  0x50   : >> { %v385_v61 = vadd.f32 %v377_v27, %v354_v48  ;;  %v287_v7 = vmul.f32 %v1047_v2, %v272_v59  ;;  %v334_v8 = vld [vmem:[%s1053_s8 + $0xd8] sm:$0xff]  ;;  %v365_v9 = vld [vmem:[%s1053_s8 + $0xe0] sm:$0xff]  ;;  %v318_v15 = vmul.f32 %v1049_v3, %v303_v60  ;;  %v441_v18 = vmul.f32 %v1064_v10, %v426_v53  ;;  %v396_v21 = vld [vmem:[%s1053_s8 + $0xe8] sm:$0xff] }
  0x51   : >> { %v355_v12 = vadd.f32 %v347_v37, %v324_v54  ;;  %v325_v13 = vadd.f32 %v317_v51, %v294_v56  ;;  %v242_v16 = vld [vmem:[%s1053_s8 + $0x100] sm:$0xff]  ;;  %v349_v20 = vmul.f32 %v1055_v4, %v334_v8  ;;  %v273_v22 = vld [vmem:[%s1053_s8 + $0x108] sm:$0xff]  ;;  %v304_v23 = vld [vmem:[%s1053_s8 + $0x110] sm:$0xff]  ;;  %v472_v26 = vmul.f32 %v1066_v11, %v457_v63 }
  0x52   : >> { %v416_v17 = vadd.f32 %v408_v28, %v385_v61  ;;  %v295_v19 = vadd.f32 %v287_v7, %v256_v0  ;;  %v380_v27 = vmul.f32 %v1057_v5, %v365_v9  ;;  %v335_v29 = vld [vmem:[%s1053_s8 + $0x118] sm:$0xff]  ;;  %v427_v28 = vld [vmem:[%s1053_s8 + $0xf0] sm:$0xff]  ;;  %v257_v33 = vmul.f32 %v1045_v1, %v242_v16  ;;  %v487_v37 = vld [vmem:[%s1134_s9] sm:$0xff] }
  0x53   : >> { %v386_v24 = vadd.f32 %v378_v42, %v355_v12  ;;  %v356_v25 = vadd.f32 %v348_v57, %v325_v13  ;;  %v458_v32 = vld [vmem:[%s1053_s8 + $0xf8] sm:$0xff]  ;;  %v288_v34 = vmul.f32 %v1047_v2, %v273_v22  ;;  %v319_v40 = vmul.f32 %v1049_v3, %v304_v23  ;;  %v366_v41 = vld [vmem:[%s1053_s8 + $0x120] sm:$0xff]  ;;  %v274_v47 = vld [vmem:[%s1053_s8 + $0x148] sm:$0xff] }
  0x54   : >> { %v447_v30 = vadd.f32 %v439_v35, %v416_v17  ;;  %v326_v31 = vadd.f32 %v318_v15, %v295_v19  ;;  %v411_v35 = vmul.f32 %v1059_v6, %v396_v21  ;;  %v350_v45 = vmul.f32 %v1055_v4, %v335_v29  ;;  %v243_v46 = vld [vmem:[%s1053_s8 + $0x140] sm:$0xff]  ;;  %v397_v53 = vld [vmem:[%s1053_s8 + $0x128] sm:$0xff]  ;;  %v305_v54 = vld [vmem:[%s1053_s8 + $0x150] sm:$0xff] }
  0x55   : >> { %v417_v38 = vadd.f32 %v409_v49, %v386_v24  ;;  %v387_v39 = vadd.f32 %v379_v62, %v356_v25  ;;  %v296_v44 = vadd.f32 %v288_v34, %v257_v33  ;;  %v442_v51 = vmul.f32 %v1064_v10, %v427_v28  ;;  %v488_v56 = vld [vmem:[%s1134_s9 + $0x8] sm:$0xff]  ;;  %v336_v60 = vld [vmem:[%s1053_s8 + $0x158] sm:$0xff]  ;;  %v428_v62 = vld [vmem:[%s1053_s8 + $0x130] sm:$0xff] }
  0x56   : >> { %v478_v42 = vadd.f32 %v470_v36, %v447_v30  ;;  %v357_v43 = vadd.f32 %v349_v20, %v326_v31  ;;  %v473_v52 = vmul.f32 %v1066_v11, %v458_v32  ;;  %v381_v59 = vmul.f32 %v1057_v5, %v366_v41  ;;  %v459_v63 = vld [vmem:[%s1053_s8 + $0x138] sm:$0xff]  ;;  %v489_v8 = vld [vmem:[%s1134_s9 + $0x10] sm:$0xff]  ;;  %v244_v15 = vld [vmem:[%s1053_s8 + $0x180] sm:$0xff] }
  0x57   : >> { %v448_v48 = vadd.f32 %v440_v50, %v417_v38  ;;  %v418_v49 = vadd.f32 %v410_v14, %v387_v39  ;;  %v327_v58 = vadd.f32 %v319_v40, %v296_v44  ;;  %v258_v0 = vmul.f32 %v1045_v1, %v243_v46  ;;  %v275_v20 = vld [vmem:[%s1053_s8 + $0x188] sm:$0xff]  ;;  %v306_v21 = vld [vmem:[%s1053_s8 + $0x190] sm:$0xff]  ;;  %v337_v32 = vld [vmem:[%s1053_s8 + $0x198] sm:$0xff] }
  0x58   : >> { %v495_v36 = vadd.f32 %v487_v37, %v478_v42  ;;  %v388_v57 = vadd.f32 %v380_v27, %v357_v43  ;;  %v289_v7 = vmul.f32 %v1047_v2, %v274_v47  ;;  %v412_v13 = vmul.f32 %v1059_v6, %v397_v53  ;;  %v398_v27 = vld [vmem:[%s1053_s8 + $0x168] sm:$0xff]  ;;  %v429_v37 = vld [vmem:[%s1053_s8 + $0x170] sm:$0xff]  ;;  %v368_v43 = vld [vmem:[%s1053_s8 + $0x1a0] sm:$0xff] }
  0x59   : >> { %v479_v61 = vadd.f32 %v471_v55, %v448_v48  ;;  %v449_v50 = vadd.f32 %v441_v18, %v418_v49  ;;  %v358_v12 = vadd.f32 %v350_v45, %v327_v58  ;;  %v320_v14 = vmul.f32 %v1049_v3, %v305_v54  ;;  %v367_v55 = vld [vmem:[%s1053_s8 + $0x160] sm:$0xff]  ;;  %v276_v40 = vld [vmem:[%s1053_s8 + $0x1c8] sm:$0xff]  ;;  %v307_v44 = vld [vmem:[%s1053_s8 + $0x1d0] sm:$0xff] }
  0x5a   : >> { %503 = vst [vmem:[%s1134_s9] sm:$0xff] %v495_v36  ;;  %v419_v9 = vadd.f32 %v411_v35, %v388_v57  ;;  %v297_v18 = vadd.f32 %v289_v7, %v258_v0  ;;  %v351_v19 = vmul.f32 %v1055_v4, %v336_v60  ;;  %v443_v24 = vmul.f32 %v1064_v10, %v428_v62  ;;  %v245_v35 = vld [vmem:[%s1053_s8 + $0x1c0] sm:$0xff]  ;;  %v460_v47 = vld [vmem:[%s1053_s8 + $0x178] sm:$0xff]  ;;  %v399_v36 = vld [vmem:[%s1053_s8 + $0x1a8] sm:$0xff] }
  0x5b   : >> { %v496_v16 = vadd.f32 %v488_v56, %v479_v61  ;;  %v480_v17 = vadd.f32 %v472_v26, %v449_v50  ;;  %v389_v23 = vadd.f32 %v381_v59, %v358_v12  ;;  %v474_v25 = vmul.f32 %v1066_v11, %v459_v63  ;;  %v490_v26 = vld [vmem:[%s1134_s9 + $0x18] sm:$0xff]  ;;  %v369_v50 = vld [vmem:[%s1053_s8 + $0x1e0] sm:$0xff]  ;;  %v430_v0 = vld [vmem:[%s1053_s8 + $0x1b0] sm:$0xff] }
  0x5c   : >> { %v450_v22 = vadd.f32 %v442_v51, %v419_v9  ;;  %v328_v30 = vadd.f32 %v320_v14, %v297_v18  ;;  %v382_v31 = vmul.f32 %v1057_v5, %v367_v55  ;;  %v259_v28 = vmul.f32 %v1045_v1, %v244_v15  ;;  %v338_v51 = vld [vmem:[%s1053_s8 + $0x1d8] sm:$0xff]  ;;  %v400_v12 = vld [vmem:[%s1053_s8 + $0x1e8] sm:$0xff]  ;;  %v431_v18 = vld [vmem:[%s1053_s8 + $0x1f0] sm:$0xff] }
  0x5d   : >> { %504 = vst [vmem:[%s1134_s9 + $0x8] sm:$0xff] %v496_v16  ;;  %v497_v29 = vadd.f32 %v489_v8, %v480_v17  ;;  %v420_v34 = vadd.f32 %v412_v13, %v389_v23  ;;  %v290_v38 = vmul.f32 %v1047_v2, %v275_v20  ;;  %v321_v39 = vmul.f32 %v1049_v3, %v306_v21  ;;  %v461_v14 = vld [vmem:[%s1053_s8 + $0x1b8] sm:$0xff]  ;;  %v492_v15 = vld [vmem:[%s1134_s9 + $0x28] sm:$0xff] }
  0x5e   : >> { %v481_v33 = vadd.f32 %v473_v52, %v450_v22  ;;  %v359_v41 = vadd.f32 %v351_v19, %v328_v30  ;;  %v413_v42 = vmul.f32 %v1059_v6, %v398_v27  ;;  %v352_v49 = vmul.f32 %v1055_v4, %v337_v32  ;;  %v491_v52 = vld [vmem:[%s1134_s9 + $0x20] sm:$0xff]  ;;  %v462_v23 = vld [vmem:[%s1053_s8 + $0x1f8] sm:$0xff] }
  0x5f   : >> { %505 = vst [vmem:[%s1134_s9 + $0x10] sm:$0xff] %v497_v29  ;;  %v451_v46 = vadd.f32 %v443_v24, %v420_v34  ;;  %v298_v48 = vadd.f32 %v290_v38, %v259_v28  ;;  %v444_v54 = vmul.f32 %v1064_v10, %v429_v37  ;;  %v260_v56 = vmul.f32 %v1045_v1, %v245_v35  ;;  %v493_v29 = vld [vmem:[%s1134_s9 + $0x30] sm:$0xff] }
  0x60   : >> { %v498_v45 = vadd.f32 %v490_v26, %v481_v33  ;;  %v390_v53 = vadd.f32 %v382_v31, %v359_v41  ;;  %v291_v57 = vmul.f32 %v1047_v2, %v276_v40  ;;  %v383_v60 = vmul.f32 %v1057_v5, %v368_v43 }
  0x61   : >> { %v482_v58 = vadd.f32 %v474_v25, %v451_v46  ;;  %v329_v59 = vadd.f32 %v321_v39, %v298_v48  ;;  %v322_v61 = vmul.f32 %v1049_v3, %v307_v44  ;;  %v475_v63 = vmul.f32 %v1066_v11, %v460_v47 }
  0x62   : >> { %506 = vst [vmem:[%s1134_s9 + $0x18] sm:$0xff] %v498_v45  ;;  %v421_v62 = vadd.f32 %v413_v42, %v390_v53  ;;  %v299_v1 = vadd.f32 %v291_v57, %v260_v56  ;;  %v353_v7 = vmul.f32 %v1055_v4, %v338_v51  ;;  %v414_v9 = vmul.f32 %v1059_v6, %v399_v36 }
  0x63   : >> { %v499_v2 = vadd.f32 %v491_v52, %v482_v58  ;;  %v360_v8 = vadd.f32 %v352_v49, %v329_v59  ;;  %v384_v3 = vmul.f32 %v1057_v5, %v369_v50  ;;  %v445_v17 = vmul.f32 %v1064_v10, %v430_v0 }
  0x64   : >> { %v452_v13 = vadd.f32 %v444_v54, %v421_v62  ;;  %v330_v55 = vadd.f32 %v322_v61, %v299_v1  ;;  %v415_v20 = vmul.f32 %v1059_v6, %v400_v12  ;;  %v476_v22 = vmul.f32 %v1066_v11, %v461_v14  ;;  %v494_v6 = vld [vmem:[%s1134_s9 + $0x38] sm:$0xff] }
  0x65   : >> { %507 = vst [vmem:[%s1134_s9 + $0x20] sm:$0xff] %v499_v2  ;;  %v391_v16 = vadd.f32 %v383_v60, %v360_v8  ;;  %v446_v25 = vmul.f32 %v1064_v10, %v431_v18  ;;  %v477_v30 = vmul.f32 %v1066_v11, %v462_v23 }
  0x66   : >> { %v483_v4 = vadd.f32 %v475_v63, %v452_v13  ;;  %v361_v19 = vadd.f32 %v353_v7, %v330_v55 }
  0x67   : >> { %v422_v21 = vadd.f32 %v414_v9, %v391_v16 }
  0x68   : >> { %v500_v5 = vadd.f32 %v492_v15, %v483_v4  ;;  %v392_v24 = vadd.f32 %v384_v3, %v361_v19 }
  0x69   : >> { %v453_v27 = vadd.f32 %v445_v17, %v422_v21 }
  0x6a   : >> { %508 = vst [vmem:[%s1134_s9 + $0x28] sm:$0xff] %v500_v5  ;;  %v423_v26 = vadd.f32 %v415_v20, %v392_v24 }
  0x6b   : >> { %v484_v31 = vadd.f32 %v476_v22, %v453_v27 }
  0x6c   : >> { %v454_v28 = vadd.f32 %v446_v25, %v423_v26 }
  0x6d   : >> { %v501_v32 = vadd.f32 %v493_v29, %v484_v31 }
  0x6e   : >> { %v485_v33 = vadd.f32 %v477_v30, %v454_v28  ;;  %230 = sbr.rel (!%p228_p3) target bundleno = 67 (0x43), region = 90 }
  0x6f   : >> { %509 = vst [vmem:[%s1134_s9 + $0x30] sm:$0xff] %v501_v32 }
  0x70   : >> { %v502_v34 = vadd.f32 %v494_v6, %v485_v33 }
  0x72   : >> { %510 = vst [vmem:[%s1134_s9 + $0x38] sm:$0xff] %v502_v34 }
  0x79   : > { %v516_v10 = vld [vmem:[#allocation2 + $0x10] sm:$0xff]  ;;  %v514_v37 = vld [vmem:[#allocation2] sm:$0xff]  ;;  %v517_v38 = vld [vmem:[#allocation2 + $0x18] sm:$0xff] }
  0x7a   : > { %534 = vadd.xlane.f32.xlu1 %v516_v10  ;;  %530 = vadd.xlane.f32.xlu0 %v514_v37  ;;  %v515_v11 = vld [vmem:[#allocation2 + $0x8] sm:$0xff]  ;;  %v518_v35 = vld [vmem:[#allocation2 + $0x20] sm:$0xff]  ;;  %v521_v40 = vld [vmem:[#allocation2 + $0x38] sm:$0xff] }
  0x7b   : > { %v519_v39 = vld [vmem:[#allocation2 + $0x28] sm:$0xff]  ;;  %v520_v41 = vld [vmem:[#allocation2 + $0x30] sm:$0xff]  ;;  %v522_v43 = vld [vmem:[#allocation2 + $0x40] sm:$0xff] }
  0x7c   : > { %v523_v42 = vld [vmem:[#allocation2 + $0x48] sm:$0xff]  ;;  %v525_v44 = vld [vmem:[#allocation2 + $0x58] sm:$0xff]  ;;  %v524_v45 = vld [vmem:[#allocation2 + $0x50] sm:$0xff] }
  0x7d   : > { %v527_v46 = vld [vmem:[#allocation2 + $0x68] sm:$0xff]  ;;  %v526_v47 = vld [vmem:[#allocation2 + $0x60] sm:$0xff]  ;;  %v529_v48 = vld [vmem:[#allocation2 + $0x78] sm:$0xff] }
  0x7e   : > { %536 = vadd.xlane.f32.xlu1 %v517_v38  ;;  %532 = vadd.xlane.f32.xlu0 %v515_v11  ;;  %v528_v49 = vld [vmem:[#allocation2 + $0x70] sm:$0xff] }
  0x82   : > { %540 = vadd.xlane.f32.xlu1 %v519_v39  ;;  %538 = vadd.xlane.f32.xlu0 %v518_v35 }
  0x86   : > { %544 = vadd.xlane.f32.xlu1 %v521_v40  ;;  %542 = vadd.xlane.f32.xlu0 %v520_v41 }
  0x8a   : > { %548 = vadd.xlane.f32.xlu1 %v523_v42  ;;  %546 = vadd.xlane.f32.xlu0 %v522_v43 }
  0x8e   : > { %552 = vadd.xlane.f32.xlu1 %v525_v44  ;;  %550 = vadd.xlane.f32.xlu0 %v524_v45 }
  0x92   : > { %556 = vadd.xlane.f32.xlu1 %v527_v46  ;;  %554 = vadd.xlane.f32.xlu0 %v526_v47 }
  0x96   : > { %560 = vadd.xlane.f32.xlu1 %v529_v48  ;;  %558 = vadd.xlane.f32.xlu0 %v528_v49 }
 0x103   : > { %v535_v51 = vpop.xlane.xlu1 %534  ;;  %v531_v52 = vpop.xlane.xlu0 %530 }
 0x104   : > { %565 = vst.msk [vmem:[%s1035_s23 + $0x10] sm:$0xff] %vm562_vm0, %v535_v51  ;;  %563 = vst.msk [vmem:[%s1035_s23] sm:$0xff] %vm562_vm0, %v531_v52 }
 0x107   : > { %v537_v53 = vpop.xlane.xlu1 %536  ;;  %v533_v54 = vpop.xlane.xlu0 %532 }
 0x108   : > { %566 = vst.msk [vmem:[%s1035_s23 + $0x18] sm:$0xff] %vm562_vm0, %v537_v53  ;;  %564 = vst.msk [vmem:[%s1035_s23 + $0x8] sm:$0xff] %vm562_vm0, %v533_v54 }
 0x10b   : > { %v541_v36 = vpop.xlane.xlu1 %540  ;;  %v539_v56 = vpop.xlane.xlu0 %538 }
 0x10c   : > { %568 = vst.msk [vmem:[%s1035_s23 + $0x28] sm:$0xff] %vm562_vm0, %v541_v36  ;;  %567 = vst.msk [vmem:[%s1035_s23 + $0x20] sm:$0xff] %vm562_vm0, %v539_v56 }
 0x10f   : > { %v545_v57 = vpop.xlane.xlu1 %544  ;;  %v543_v58 = vpop.xlane.xlu0 %542 }
 0x110   : > { %570 = vst.msk [vmem:[%s1035_s23 + $0x38] sm:$0xff] %vm562_vm0, %v545_v57  ;;  %569 = vst.msk [vmem:[%s1035_s23 + $0x30] sm:$0xff] %vm562_vm0, %v543_v58 }
 0x113   : > { %v549_v59 = vpop.xlane.xlu1 %548  ;;  %v547_v60 = vpop.xlane.xlu0 %546 }
 0x114   : > { %572 = vst.msk [vmem:[%s1035_s23 + $0x48] sm:$0xff] %vm562_vm0, %v549_v59  ;;  %571 = vst.msk [vmem:[%s1035_s23 + $0x40] sm:$0xff] %vm562_vm0, %v547_v60 }
 0x117   : > { %v553_v61 = vpop.xlane.xlu1 %552  ;;  %v551_v50 = vpop.xlane.xlu0 %550 }
 0x118   : > { %574 = vst.msk [vmem:[%s1035_s23 + $0x58] sm:$0xff] %vm562_vm0, %v553_v61  ;;  %573 = vst.msk [vmem:[%s1035_s23 + $0x50] sm:$0xff] %vm562_vm0, %v551_v50 }
 0x11b   : > { %v557_v62 = vpop.xlane.xlu1 %556  ;;  %v555_v63 = vpop.xlane.xlu0 %554 }
 0x11c   : > { %576 = vst.msk [vmem:[%s1035_s23 + $0x68] sm:$0xff] %vm562_vm0, %v557_v62  ;;  %575 = vst.msk [vmem:[%s1035_s23 + $0x60] sm:$0xff] %vm562_vm0, %v555_v63 }
 0x11f   : > { %v561_v0 = vpop.xlane.xlu1 %560  ;;  %v559_v1 = vpop.xlane.xlu0 %558 }
 0x120   : > { %578 = vst.msk [vmem:[%s1035_s23 + $0x78] sm:$0xff] %vm562_vm0, %v561_v0  ;;  %577 = vst.msk [vmem:[%s1035_s23 + $0x70] sm:$0xff] %vm562_vm0, %v559_v1 }
 0x121 PF: > { %s16_s14 = sadd.s32 1, %s898_s14   ;;  %s1279_s9 = smov %s882_s10 }
 0x122   : > { %p13_p4 = scmp.ge.s32.totalorder %s16_s14, 4   ;;  %s1280_s10 = smov %s886_s11 }
 0x123   : > { %s1281_s11 = smov %s1009_s26  ;;  %s1282_s12 = smov %s894_s13 }
 0x124   : > { %s1283_s13 = smov %s1285_s27  ;;  %15 = sbr.rel (!%p13_p4) target bundleno = 5 (0x5), region = 101 }
 0x129   :  { %601 = vsyncpa [#allocation4], 1 }
 0x12a   :  { %603 = vsyncpa [#allocation4 + $0x1], 1 }
 0x12b   :  { %604 = vsyncpa [#allocation6], 1 }

</bundles_post_ra>
